<compile_context>
chip_gen: v6e
topology: v6e:2x2x1
jax: 0.10.0
libtpu: 0.0.40
codegen_flags: <defaults>
</compile_context>

<pallas_src>
import functools

import jax
import jax.numpy as jnp
from jax.experimental import pallas as pl
from jax.experimental.pallas import tpu as pltpu

LANE = 128
SUBLANE = 8


def _round_up(x, m):
    return ((x + m - 1) // m) * m


def _pick_batch_tile(B, tile_b):
    """Largest multiple-of-8 batch tile <= tile_b with >=2 tiles for B > 8.

    >=2 tiles lets dimension_semantics=("parallel",) shard the batch over
    v7x's two TensorCores; balancing via cdiv keeps ragged-tail waste < 1 tile.
    """
    if B <= SUBLANE:
        return B                                   # single full-extent block
    n_tiles = max(pl.cdiv(B, tile_b), 2)
    tb = _round_up(pl.cdiv(B, n_tiles), SUBLANE)
    return min(tb, _round_up(B, SUBLANE))


def _agent_kernel(x_ref, w1_ref, b1_ref, w2_ref, b2_ref, o_ref):
    # x_ref:  (tb, 300) f32   streamed batch tile (bf16 cast happens here)
    # w1_ref: (300, 256) bf16 VMEM resident
    # b1_ref: (1, 256)   f32
    # w2_ref: (256, 3)   bf16 VMEM resident
    # b2_ref: (1, 3)     f32
    # o_ref:  (tb, 3)    f32  final output tile (no wrapper post-processing)
    x = x_ref[...].astype(w1_ref.dtype)            # VPU cast, hidden under DMA
    h = jnp.dot(x, w1_ref[...], preferred_element_type=jnp.float32)
    h = jnp.maximum(h + b1_ref[...], 0.0)          # bias + ReLU in f32
    o = jnp.dot(h.astype(w2_ref.dtype), w2_ref[...],
                preferred_element_type=jnp.float32)
    o_ref[...] = (o + b2_ref[...]).astype(o_ref.dtype)


def prepare_params(w1, b1, w2, b2, *, compute_dtype=jnp.bfloat16):
    """One-time parameter prep, hoisted out of the per-call path."""
    w1_p = w1.astype(compute_dtype)                # (300, 256)
    b1_p = b1.reshape(1, -1).astype(jnp.float32)   # (1, 256)
    w2_p = w2.astype(compute_dtype)                # (256, 3)
    b2_p = b2.reshape(1, -1).astype(jnp.float32)   # (1, 3)
    return w1_p, b1_p, w2_p, b2_p


@functools.partial(jax.jit, static_argnames=("tile_b",))
def agent_forward(in_data, w1_p, b1_p, w2_p, b2_p, *, tile_b=1024):
    """in_data: (B, 3, 10, 10) f32 -> (B, 3) f32 (same math as Agent.forward)."""
    B = in_data.shape[0]
    K, H = w1_p.shape          # (300, 256)
    N = w2_p.shape[1]          # 3

    # nn.Flatten on NCHW.  (Callers that can present a pre-flattened (B, 300)
    # activation avoid even this single relayout.)
    x = in_data.reshape(B, K)

    tb = _pick_batch_tile(B, tile_b)
    grid = (pl.cdiv(B, tb),)   # ragged last block; OOB output rows are dropped

    return pl.pallas_call(
        _agent_kernel,
        out_shape=jax.ShapeDtypeStruct((B, N), jnp.float32),
        grid=grid,
        in_specs=[
            pl.BlockSpec((tb, K), lambda i: (i, 0)),   # streamed f32 x tiles
            pl.BlockSpec((K, H), lambda i: (0, 0)),    # resident weights
            pl.BlockSpec((1, H), lambda i: (0, 0)),
            pl.BlockSpec((H, N), lambda i: (0, 0)),
            pl.BlockSpec((1, N), lambda i: (0, 0)),
        ],
        out_specs=pl.BlockSpec((tb, N), lambda i: (i, 0)),
        compiler_params=pltpu.CompilerParams(
            dimension_semantics=("parallel",),   # batch tiles independent;
                                                 # v7x shards them over 2 TCs
        ),
    )(x, w1_p, b1_p, w2_p, b2_p)


def init_params(key):
    """Deterministic init matching PyTorch Linear shapes (stored transposed)."""
    k1, k2, k3, k4 = jax.random.split(key, 4)
    in1, out1 = 3 * 10 * 10, 256
    in2, out2 = 256, 3
    bound1 = 1.0 / jnp.sqrt(in1)
    bound2 = 1.0 / jnp.sqrt(in2)
    w1 = jax.random.uniform(k1, (in1, out1), jnp.float32, -bound1, bound1)
    b1 = jax.random.uniform(k2, (out1,), jnp.float32, -bound1, bound1)
    w2 = jax.random.uniform(k3, (in2, out2), jnp.float32, -bound2, bound2)
    b2 = jax.random.uniform(k4, (out2,), jnp.float32, -bound2, bound2)
    return w1, b1, w2, b2


def reference_forward_bf16(in_data, w1, b1, w2, b2):
    """Mirrors the kernel numerics: bf16 matmul operands, f32 accumulate/epilogue."""
    x = in_data.reshape(in_data.shape[0], -1).astype(jnp.bfloat16)
    h = jnp.dot(x, w1.astype(jnp.bfloat16), preferred_element_type=jnp.float32)
    h = jnp.maximum(h + b1, 0.0)
    o = jnp.dot(h.astype(jnp.bfloat16), w2.astype(jnp.bfloat16),
                preferred_element_type=jnp.float32)
    return o + b2


def reference_forward_f32(in_data, w1, b1, w2, b2):
    """Exact f32 math of the PyTorch Agent (for loose parity check)."""
    x = in_data.reshape(in_data.shape[0], -1)
    h = jnp.maximum(x @ w1 + b1, 0.0)
    return h @ w2 + b2


if __name__ == "__main__":
    key = jax.random.PRNGKey(0)
    k_in, k_in2, k_par = jax.random.split(key, 3)

    w1, b1, w2, b2 = init_params(k_par)
    params = prepare_params(w1, b1, w2, b2)   # once, outside the per-call path

    # Small batch: single full-extent tile.
    B = 8
    in_data = jax.random.normal(k_in, (B, 3, 10, 10), dtype=jnp.float32)
    out = jax.block_until_ready(agent_forward(in_data, *params))
    assert out.shape == (B, 3), out.shape

    ref = reference_forward_bf16(in_data, w1, b1, w2, b2)
    assert jnp.allclose(out, ref, atol=1e-2, rtol=1e-2), (
        "mismatch vs bf16-mirrored reference",
        float(jnp.max(jnp.abs(out - ref))))
    # Note: kernel uses bf16 matmul operands, so parity vs the true f32 Agent
    # is only to ~bf16 quantization error.
    ref32 = reference_forward_f32(in_data, w1, b1, w2, b2)
    assert jnp.allclose(out, ref32, atol=5e-2, rtol=5e-2), (
        "mismatch vs f32 reference",
        float(jnp.max(jnp.abs(out - ref32))))

    # Larger batch exercising the multi-tile, ragged "parallel" grid path.
    B2 = 40
    in_data2 = jax.random.normal(k_in2, (B2, 3, 10, 10), dtype=jnp.float32)
    out2 = jax.block_until_ready(agent_forward(in_data2, *params))
    assert out2.shape == (B2, 3), out2.shape
    ref2 = reference_forward_bf16(in_data2, w1, b1, w2, b2)
    assert jnp.allclose(out2, ref2, atol=1e-2, rtol=1e-2), (
        "mismatch vs bf16-mirrored reference (multi-tile)",
        float(jnp.max(jnp.abs(out2 - ref2))))

    print("KERNEL_OK")
</pallas_src>

<mosaic_0001>
module attributes {stable_mosaic.version = 11 : i64} {
  func.func @_agent_kernel(%arg0: i32, %arg1: memref<8x300xf32, #tpu.memory_space<vmem>>, %arg2: memref<300x256xbf16, #tpu.memory_space<vmem>>, %arg3: memref<1x256xf32, #tpu.memory_space<vmem>>, %arg4: memref<256x3xbf16, #tpu.memory_space<vmem>>, %arg5: memref<1x3xf32, #tpu.memory_space<vmem>>, %arg6: memref<8x3xf32, #tpu.memory_space<vmem>>) attributes {dimension_semantics = [#tpu.dimension_semantics<parallel>], iteration_bounds = array<i64: 1>, scalar_prefetch = 0 : i64, scratch_operands = 0 : i64, tpu.core_type = #tpu.core_type<tc>, window_params = [{transform_indices = @transform_0, window_bounds = array<i64: 8, 300>}, {pipeline_mode = #tpu.pipeline_mode<synchronous>, transform_indices = @transform_1, window_bounds = array<i64: 300, 256>}, {pipeline_mode = #tpu.pipeline_mode<synchronous>, transform_indices = @transform_2, window_bounds = array<i64: 1, 256>}, {pipeline_mode = #tpu.pipeline_mode<synchronous>, transform_indices = @transform_3, window_bounds = array<i64: 256, 3>}, {pipeline_mode = #tpu.pipeline_mode<synchronous>, transform_indices = @transform_4, window_bounds = array<i64: 1, 3>}, {transform_indices = @transform_5, window_bounds = array<i64: 8, 3>}]} {
    %c0 = arith.constant 0 : index
    %c0_0 = arith.constant 0 : index
    %0 = vector.load %arg1[%c0, %c0_0] : memref<8x300xf32, #tpu.memory_space<vmem>>, vector<8x300xf32>
    %1 = arith.truncf %0 : vector<8x300xf32> to vector<8x300xbf16>
    %c0_1 = arith.constant 0 : index
    %c0_2 = arith.constant 0 : index
    %2 = vector.load %arg2[%c0_1, %c0_2] : memref<300x256xbf16, #tpu.memory_space<vmem>>, vector<300x256xbf16>
    %cst = arith.constant dense<0.000000e+00> : vector<8x256xf32>
    %3 = tpu.matmul %1, %2, %cst {dimension_numbers = #tpu.dot_dimension_numbers<[1], [0], [0], [1], [0, 0, 1, 1], [], []>} : vector<8x300xbf16>, vector<300x256xbf16>, vector<8x256xf32> -> vector<8x256xf32>
    %c0_3 = arith.constant 0 : index
    %c0_4 = arith.constant 0 : index
    %4 = vector.load %arg3[%c0_3, %c0_4] : memref<1x256xf32, #tpu.memory_space<vmem>>, vector<1x256xf32>
    %5 = vector.broadcast %4 : vector<1x256xf32> to vector<8x256xf32>
    %6 = arith.addf %3, %5 : vector<8x256xf32>
    %cst_5 = arith.constant 0.000000e+00 : f32
    %7 = vector.broadcast %cst_5 : f32 to vector<8x256xf32>
    %8 = arith.maximumf %6, %7 : vector<8x256xf32>
    %9 = arith.truncf %8 : vector<8x256xf32> to vector<8x256xbf16>
    %c0_6 = arith.constant 0 : index
    %c0_7 = arith.constant 0 : index
    %10 = vector.load %arg4[%c0_6, %c0_7] : memref<256x3xbf16, #tpu.memory_space<vmem>>, vector<256x3xbf16>
    %cst_8 = arith.constant dense<0.000000e+00> : vector<8x3xf32>
    %11 = tpu.matmul %9, %10, %cst_8 {dimension_numbers = #tpu.dot_dimension_numbers<[1], [0], [0], [1], [0, 0, 1, 1], [], []>} : vector<8x256xbf16>, vector<256x3xbf16>, vector<8x3xf32> -> vector<8x3xf32>
    %c0_9 = arith.constant 0 : index
    %c0_10 = arith.constant 0 : index
    %12 = vector.load %arg5[%c0_9, %c0_10] : memref<1x3xf32, #tpu.memory_space<vmem>>, vector<1x3xf32>
    %13 = vector.broadcast %12 : vector<1x3xf32> to vector<8x3xf32>
    %14 = arith.addf %11, %13 : vector<8x3xf32>
    %c0_11 = arith.constant 0 : index
    %c0_12 = arith.constant 0 : index
    %15 = vector.load %arg6[%c0_11, %c0_12] : memref<8x3xf32, #tpu.memory_space<vmem>>, vector<8x3xf32>
    tpu.vector_store %arg6[%c0_11, %c0_12], %14 {strides = array<i32>} : memref<8x3xf32, #tpu.memory_space<vmem>>, vector<8x3xf32>,
    return
  }
  func.func @transform_0(%arg0: i32) -> (i32, i32) {
    %c0_i32 = arith.constant 0 : i32
    %c0_i32_0 = arith.constant 0 : i32
    return %arg0, %c0_i32 : i32, i32
  }
  func.func @transform_1(%arg0: i32) -> (i32, i32) {
    %c0_i32 = arith.constant 0 : i32
    %c0_i32_0 = arith.constant 0 : i32
    %c0_i32_1 = arith.constant 0 : i32
    return %c0_i32, %c0_i32_0 : i32, i32
  }
  func.func @transform_2(%arg0: i32) -> (i32, i32) {
    %c0_i32 = arith.constant 0 : i32
    %c0_i32_0 = arith.constant 0 : i32
    %c0_i32_1 = arith.constant 0 : i32
    return %c0_i32, %c0_i32_0 : i32, i32
  }
  func.func @transform_3(%arg0: i32) -> (i32, i32) {
    %c0_i32 = arith.constant 0 : i32
    %c0_i32_0 = arith.constant 0 : i32
    %c0_i32_1 = arith.constant 0 : i32
    return %c0_i32, %c0_i32_0 : i32, i32
  }
  func.func @transform_4(%arg0: i32) -> (i32, i32) {
    %c0_i32 = arith.constant 0 : i32
    %c0_i32_0 = arith.constant 0 : i32
    %c0_i32_1 = arith.constant 0 : i32
    return %c0_i32, %c0_i32_0 : i32, i32
  }
  func.func @transform_5(%arg0: i32) -> (i32, i32) {
    %c0_i32 = arith.constant 0 : i32
    %c0_i32_0 = arith.constant 0 : i32
    return %arg0, %c0_i32 : i32, i32
  }
}

</mosaic_0001>

<bundles_post_ra>
// kernel: agent_forward.1
= control target key start
LH: loop header
LB: loop body
LE: loop exit
PB: predicated region body
PF: predicated region fallthrough
CT: control target
= control target key end

     0   :  { %v696_v1 = vmov 0   ;;  %vm269_vm0 = vcmask 1045504   ;;  %vm265_vm1 = vcmask 359424   ;;  %vm537_vm2 = vcmask 23552   ;;  %s907_s1 = inlined_call_operand.vmem [shape: bf16[300,256], index: 1, kind: input, shape index: {}]   ;;  %s908_s0 = inlined_call_operand.vmem [shape: f32[8,300], index: 0, kind: input, shape index: {}]   ;;  %s909_s3 = inlined_call_operand.vmem [shape: bf16[256,3], index: 3, kind: input, shape index: {}]   ;;  %s910_s2 = inlined_call_operand.vmem [shape: f32[1,256], index: 2, kind: input, shape index: {}]   ;;  %s911_s4 = inlined_call_operand.vmem [shape: f32[1,3], index: 4, kind: input, shape index: {}]   ;;  %s912_s5 = inlined_call_operand.vmem [shape: f32[8,3], index: 5, kind: output, shape index: {}]  }
   0x1   :  { %v623_v0 = vld [vmem:[%s907_s1 + $0x74] ss:$8 sps:$4 sm:$0xff]   ;;  %349 = vmatprep.mubr.bf16.mxu1 %v696_v1  ;;  %v625_v2 = vld [vmem:[%s907_s1 + $0x70] ss:$8 sps:$4 sm:$0xff]   ;;  %v626_v3 = vld [vmem:[%s907_s1 + $0x64] ss:$8 sps:$4 sm:$0xff]  }
   0x2   :  { %276 = vmatprep.subr.bf16.mxu0 %v623_v0  ;;  %v628_v4 = vld [vmem:[%s907_s1 + $0x60] ss:$8 sps:$4 sm:$0xff]   ;;  %v629_v5 = vld [vmem:[%s907_s1 + $0x54] ss:$8 sps:$4 sm:$0xff]   ;;  %v631_v6 = vld [vmem:[%s907_s1 + $0x50] ss:$8 sps:$4 sm:$0xff]  }
   0x3   :  { %277 = vmatpush1.bf16.msra.mxu0 %v625_v2  ;;  %v632_v7 = vld [vmem:[%s907_s1 + $0x44] ss:$8 sps:$4 sm:$0xff]   ;;  %v634_v8 = vld [vmem:[%s907_s1 + $0x40] ss:$8 sps:$4 sm:$0xff]   ;;  %v635_v9 = vld [vmem:[%s907_s1 + $0x34] ss:$8 sps:$4 sm:$0xff]   ;;  %v67_v2 = vlaneseq }
   0x4   :  { %278 = vmatprep.subr.bf16.mxu0 %v626_v3  ;;  %v637_v10 = vld [vmem:[%s907_s1 + $0x30] ss:$8 sps:$4 sm:$0xff]   ;;  %v638_v11 = vld [vmem:[%s907_s1 + $0x24] ss:$8 sps:$4 sm:$0xff]   ;;  %v640_v14 = vld [vmem:[%s907_s1 + $0x20] ss:$8 sps:$4 sm:$0xff]  }
   0x5   :  { %v661_v12 = vld [vmem:[%s907_s1 + $0x124] ss:$8 sps:$4 sm:$0x3f]   ;;  %v664_v13 = vld [vmem:[%s907_s1 + $0x120] ss:$8 sps:$4 sm:$0x3f]  }
   0x6   :  { %581 = vmatprep.subr.msk.bf16.mxu1 %vm269_vm0, %v661_v12  ;;  %v641_v15 = vld [vmem:[%s907_s1 + $0x14] ss:$8 sps:$4 sm:$0xff]   ;;  %v271_v16 = vsel %vm269_vm0, %v664_v13, 0  ;;  %v670_v18 = vld [vmem:[%s907_s1 + $0x110] ss:$8 sps:$4 sm:$0xff]   ;;  %v22_v24 = vld [vmem:[%s908_s0 + $0x8] sm:$0xff] }
   0x7   :  { %279 = vmatpush1.bf16.msra.mxu0 %v628_v4  ;;  %v667_v17 = vld [vmem:[%s907_s1 + $0x114] ss:$8 sps:$4 sm:$0xff]   ;;  %328 = vmatpush1.bf16.msra.mxu1 %v271_v16  ;;  %v643_v19 = vld [vmem:[%s907_s1 + $0x10] ss:$8 sps:$4 sm:$0xff]   ;;  %v673_v20 = vld [vmem:[%s907_s1 + $0x104] ss:$8 sps:$4 sm:$0xff]   ;;  %v25_v26 = vpack.c.bf16 %v22_v24, %v22_v24 }
   0x8   :  { %280 = vmatprep.subr.bf16.mxu0 %v629_v5  ;;  %329 = vmatprep.subr.bf16.mxu1 %v667_v17  ;;  %v644_v21 = vld [vmem:[%s907_s1 + $0x4] ss:$8 sps:$4 sm:$0xff]   ;;  %v676_v22 = vld [vmem:[%s907_s1 + $0x100] ss:$8 sps:$4 sm:$0xff]   ;;  %v23_v23 = vld [vmem:[%s908_s0 + $0x10] sm:$0xff]  ;;  %v68_v3 = vshrl.u32 %v67_v2, 7 }
   0x9   :  { %v646_v25 = vld [vmem:[%s907_s1] ss:$8 sps:$4 sm:$0xff]   ;;  %v680_v27 = vld [vmem:[%s909_s3 + $0x78] sm:$0xff]   ;;  %v26_v29 = vpack.c.bf16 %v23_v23, %v23_v23  ;;  %308 = vmatprep.mubr.bf16.mxu0 %v25_v26  ;;  %v682_v31 = vld [vmem:[%s909_s3 + $0x70] sm:$0xff]  }
   0xa   :  { %v647_v28 = vld [vmem:[%s907_s1 + $0xf4] ss:$8 sps:$4 sm:$0xff]   ;;  %v649_v32 = vld [vmem:[%s907_s1 + $0xf0] ss:$8 sps:$4 sm:$0xff]   ;;  %v650_v33 = vld [vmem:[%s907_s1 + $0xe4] ss:$8 sps:$4 sm:$0xff]  }
   0xb   :  { %281 = vmatpush1.bf16.msra.mxu0 %v631_v6  ;;  %330 = vmatpush1.bf16.msra.mxu1 %v670_v18  ;;  %v681_v30 = vld [vmem:[%s909_s3 + $0x38] sm:$0xff]   ;;  %v652_v34 = vld [vmem:[%s907_s1 + $0xe0] ss:$8 sps:$4 sm:$0xff]   ;;  %v683_v35 = vld [vmem:[%s909_s3 + $0x30] sm:$0xff]   ;;  %v69_v4 = vsub.s32 0, %v68_v3  ;;  %v73_v6 = vsub.s32 1, %v68_v3 }
   0xc   :  { %282 = vmatprep.subr.bf16.mxu0 %v632_v7  ;;  %331 = vmatprep.subr.bf16.mxu1 %v673_v20  ;;  %v653_v36 = vld [vmem:[%s907_s1 + $0xd4] ss:$8 sps:$4 sm:$0xff]   ;;  %v684_v37 = vld [vmem:[%s909_s3 + $0x68] sm:$0xff]   ;;  %v686_v39 = vld [vmem:[%s909_s3 + $0x60] sm:$0xff]  }
   0xd   :  { %v685_v38 = vld [vmem:[%s909_s3 + $0x28] sm:$0xff]   ;;  %v655_v40 = vld [vmem:[%s907_s1 + $0xd0] ss:$8 sps:$4 sm:$0xff]   ;;  %v687_v42 = vld [vmem:[%s909_s3 + $0x20] sm:$0xff]  }
   0xe   :  { %v656_v41 = vld [vmem:[%s907_s1 + $0xc4] ss:$8 sps:$4 sm:$0xff]   ;;  %v658_v43 = vld [vmem:[%s907_s1 + $0xc0] ss:$8 sps:$4 sm:$0xff]   ;;  %v659_v44 = vld [vmem:[%s907_s1 + $0xb4] ss:$8 sps:$4 sm:$0xff]  }
   0xf   :  { %283 = vmatpush1.bf16.msra.mxu0 %v634_v8  ;;  %332 = vmatpush1.bf16.msra.mxu1 %v676_v22  ;;  %v663_v45 = vld [vmem:[%s907_s1 + $0xb0] ss:$8 sps:$4 sm:$0xff]   ;;  %v665_v46 = vld [vmem:[%s907_s1 + $0xa4] ss:$8 sps:$4 sm:$0xff]   ;;  %v669_v47 = vld [vmem:[%s907_s1 + $0xa0] ss:$8 sps:$4 sm:$0xff]  }
  0x10   :  { %284 = vmatprep.subr.bf16.mxu0 %v635_v9  ;;  %600 = vmatprep.subr.bf16.mxu1 %v680_v27  ;;  %v671_v48 = vld [vmem:[%s907_s1 + $0x94] ss:$8 sps:$4 sm:$0xff]   ;;  %v675_v49 = vld [vmem:[%s907_s1 + $0x90] ss:$8 sps:$4 sm:$0xff]   ;;  %v677_v50 = vld [vmem:[%s907_s1 + $0x84] ss:$8 sps:$4 sm:$0xff]  }
  0x11   :  { %v679_v51 = vld [vmem:[%s907_s1 + $0x80] ss:$8 sps:$4 sm:$0xff]   ;;  %v688_v54 = vld [vmem:[%s909_s3 + $0x58] sm:$0xff]   ;;  %v690_v56 = vld [vmem:[%s909_s3 + $0x50] sm:$0xff]  }
  0x12   :  { %582 = vmatmul.mubr.msk.bf16.vlgmr.msra.gmra.mxu1 %vm265_vm1, %v26_v29  ;;  %v21_v52 = vld [vmem:[%s908_s0] sm:$0xff]  ;;  %v689_v55 = vld [vmem:[%s909_s3 + $0x18] sm:$0xff]   ;;  %v691_v57 = vld [vmem:[%s909_s3 + $0x10] sm:$0xff]  }
  0x13   :  { %285 = vmatpush1.bf16.msra.mxu0 %v637_v10  ;;  %601 = vmatpush3.bf16.msra.mxu1 %v681_v30  ;;  %v24_v53 = vpack.c.bf16 %v21_v52, %v21_v52  ;;  %v692_v58 = vld [vmem:[%s909_s3 + $0x48] sm:$0xff]   ;;  %v694_v60 = vld [vmem:[%s909_s3 + $0x40] sm:$0xff]  }
  0x14   :  { %286 = vmatprep.subr.bf16.mxu0 %v638_v11  ;;  %602 = vmatprep.subr.bf16.mxu1 %v682_v31  ;;  %v693_v59 = vld [vmem:[%s909_s3 + $0x8] sm:$0xff]   ;;  %v695_v61 = vld [vmem:[%s909_s3] sm:$0xff]  }
  0x15   :  { %v65_v5 = vld [vmem:[%s910_s2] sm:$0x3] }
  0x16   :  { %v70_v7 = vrot.slane %v65_v5, %v69_v4  ;;  %v74_v8 = vrot.slane %v65_v5, %v73_v6  ;;  %v583_v22 = vld [vmem:[%s911_s4] ss:$0 sm:$0xff] }
  0x17   :  { %287 = vmatpush1.bf16.msra.mxu0 %v640_v14  ;;  %603 = vmatpush3.bf16.msra.mxu1 %v683_v35 }
  0x18   :  { %288 = vmatprep.subr.bf16.mxu0 %v641_v15  ;;  %604 = vmatprep.subr.bf16.mxu1 %v684_v37 }
  0x1b   :  { %289 = vmatpush1.bf16.msra.mxu0 %v643_v19  ;;  %605 = vmatpush3.bf16.msra.mxu1 %v685_v38 }
  0x1c   :  { %290 = vmatprep.subr.bf16.mxu0 %v644_v21  ;;  %606 = vmatprep.subr.bf16.mxu1 %v686_v39 }
  0x1f   :  { %291 = vmatpush1.bf16.msra.mxu0 %v646_v25  ;;  %607 = vmatpush3.bf16.msra.mxu1 %v687_v42 }
  0x20   :  { %292 = vmatprep.subr.bf16.mxu0 %v647_v28  ;;  %608 = vmatprep.subr.bf16.mxu1 %v688_v54 }
  0x23   :  { %293 = vmatpush2.bf16.msra.mxu0 %v649_v32  ;;  %609 = vmatpush3.bf16.msra.mxu1 %v689_v55 }
  0x24   :  { %294 = vmatprep.subr.bf16.mxu0 %v650_v33  ;;  %610 = vmatprep.subr.bf16.mxu1 %v690_v56 }
  0x27   :  { %295 = vmatpush2.bf16.msra.mxu0 %v652_v34  ;;  %611 = vmatpush3.bf16.msra.mxu1 %v691_v57 }
  0x28   :  { %296 = vmatprep.subr.bf16.mxu0 %v653_v36  ;;  %612 = vmatprep.subr.bf16.mxu1 %v692_v58 }
  0x2b   :  { %297 = vmatpush2.bf16.msra.mxu0 %v655_v40  ;;  %613 = vmatpush3.bf16.msra.mxu1 %v693_v59 }
  0x2c   :  { %298 = vmatprep.subr.bf16.mxu0 %v656_v41  ;;  %614 = vmatprep.subr.bf16.mxu1 %v694_v60 }
  0x2f   :  { %299 = vmatpush2.bf16.msra.mxu0 %v658_v43  ;;  %615 = vmatpush3.bf16.msra.mxu1 %v695_v61 }
  0x30   :  { %300 = vmatprep.subr.bf16.mxu0 %v659_v44 }
  0x33   :  { %301 = vmatpush2.bf16.msra.mxu0 %v663_v45 }
  0x34   :  { %302 = vmatprep.subr.bf16.mxu0 %v665_v46 }
  0x37   :  { %303 = vmatpush2.bf16.msra.mxu0 %v669_v47 }
  0x38   :  { %304 = vmatprep.subr.bf16.mxu0 %v671_v48 }
  0x3b   :  { %305 = vmatpush2.bf16.msra.mxu0 %v675_v49 }
  0x3c   :  { %306 = vmatprep.subr.bf16.mxu0 %v677_v50 }
  0x3f   :  { %307 = vmatpush2.bf16.msra.mxu0 %v679_v51 }
  0x42   :  { %309 = vmatmul.mubr.bf16.vlgmr.msra.gmra.mxu0 %v24_v53 }
  0xd2   :  { %v351_v62 = vpop.f32.mrf.mxu1 }
  0xd4   :  { %v353_v63 = vpop.f32.mrf.mxu1 }
  0xd6   :  { %v355_v0 = vpop.f32.mrf.mxu1 }
  0xd8   :  { %v356_v1 = vpop.f32.mrf.mxu1 }
 0x102   :  { %v310_v9 = vpop.f32.mrf.mxu0 }
 0x103   :  { %v311_v10 = vadd.f32 %v310_v9, %v70_v7 }
 0x104   :  { %v312_v11 = vpop.f32.mrf.mxu0 }
 0x105   :  { %v352_v12 = vadd.f32 %v351_v62, %v311_v10  ;;  %v313_v13 = vadd.f32 %v312_v11, %v74_v8 }
 0x106   :  { %v314_v14 = vpop.f32.mrf.mxu0 }
 0x107   :  { %v354_v15 = vadd.f32 %v353_v63, %v313_v13  ;;  %v358_v16 = vmax.f32 %v352_v12, 0.0 }
 0x108   :  { %v315_v17 = vpop.f32.mrf.mxu0 }
 0x109   :  { %v359_v18 = vmax.f32 %v354_v15, 0.0  ;;  %v360_v20 = vpack.c.bf16 %v358_v16, %v358_v16 }
 0x10b   :  { %v361_v19 = vpack.c.bf16 %v359_v18, %v359_v18 }
 0x10d   :  { %529 = vmatprep.mubr.bf16.mxu1 %v361_v19 }
 0x10e   :  { %530 = vmatmul.mubr.bf16.vlgmr.msra.gmra.mxu1 %v360_v20 }
 0x1ce   :  { %v616_v21 = vpop.f32.mrf.mxu1 }
 0x1d0   :  { %v617_v23 = vpop.f32.mrf.mxu1 }
 0x1d1   :  { %v618_v24 = vadd.f32 %v617_v23, %v616_v21 }
 0x1d2   :  { %v619_v25 = vpop.f32.mrf.mxu1 }
 0x1d3   :  { %v532_v26 = vadd.f32 %v618_v24, %v583_v22 }
 0x1d4   :  { %v620_v27 = vpop.f32.mrf.mxu1 }
 0x1d5   :  { %538 = vst.msk [vmem:[%s912_s5] sm:$0xff] %vm537_vm2, %v532_v26 }

</bundles_post_ra>
